<compile_context>
chip_gen: v5e
topology: v5e:2x2
jax: 0.10.0
libtpu: 0.0.40
codegen_flags: <defaults>
</compile_context>

<pallas_src>
import functools

import jax
import jax.numpy as jnp
from jax import lax
from jax.experimental import pallas as pl
from jax.experimental.pallas import tpu as pltpu


def _round_up(a, m):
    return ((a + m - 1) // m) * m


def _cdiv(a, b):
    return (a + b - 1) // b


# ---------------------------------------------------------------------------
# Kernels
# ---------------------------------------------------------------------------

def _linear_kernel_fused(x_ref, w_ref, b_ref, o_ref):
    """Whole-K tile (tk == K exactly): one MXU dot + bias + store per tile."""
    acc = lax.dot_general(
        x_ref[...], w_ref[...],
        dimension_numbers=(((1,), (1,)), ((), ())),   # x @ w.T (NT form)
        preferred_element_type=jnp.float32)
    o_ref[...] = (acc + b_ref[...].astype(jnp.float32)).astype(o_ref.dtype)


def _linear_kernel_split(x_ref, w_ref, b_ref, o_ref, acc_ref, *,
                         k_valid, tk, mask_k):
    """Split-K: f32 VMEM accumulator over the innermost ('arbitrary') K axis."""
    k = pl.program_id(2)

    @pl.when(k == 0)
    def _():
        acc_ref[...] = jnp.zeros_like(acc_ref)

    x = x_ref[...]
    if mask_k:
        # Ragged K tail of the UNPADDED activation: OOB lanes of the partial
        # block are unspecified -> force exact zeros so they contribute 0 to
        # the contraction (the weight's K tail is zero-padded in the wrapper).
        col = k * tk + lax.broadcasted_iota(jnp.int32, x.shape, 1)
        x = jnp.where(col < k_valid, x, jnp.zeros_like(x))

    acc_ref[...] += lax.dot_general(
        x, w_ref[...],
        dimension_numbers=(((1,), (1,)), ((), ())),   # x @ w.T (NT form)
        preferred_element_type=jnp.float32)

    @pl.when(k == pl.num_programs(2) - 1)
    def _():
        o_ref[...] = (acc_ref[...] + b_ref[...].astype(jnp.float32)
                      ).astype(o_ref.dtype)


# ---------------------------------------------------------------------------
# Hardware queries (trace-time, with safe fallbacks)
# ---------------------------------------------------------------------------

def _vmem_capacity_bytes():
    try:
        info = pltpu.get_tpu_info()
        cap = getattr(info, "vmem_capacity_bytes", None)
        if cap:
            return int(cap)
    except Exception:
        pass
    return 64 << 20          # conservative default (v7x-sized)


def _num_tensorcores():
    try:
        info = pltpu.get_tpu_info()
        for name in ("num_cores", "core_count", "tensorcore_count",
                     "num_tensorcores", "tensorcores_per_chip",
                     "cores_per_chip"):
            v = getattr(info, name, None)
            if isinstance(v, int) and v > 0:
                return v
    except Exception:
        pass
    return 1


# ---------------------------------------------------------------------------
# Tile selection
# ---------------------------------------------------------------------------

def _dim_tile_candidates(dim, granule, caps):
    """Tile candidates for one dim.

    Small dims use the full dim (exact block, always legal).  Larger dims use
    granule multiples that never exceed the dim, so every block is either full
    or a standard partial last block.
    """
    if dim <= granule:
        return [dim]
    floor = (dim // granule) * granule
    out = []
    for c in caps:
        t = min(c, floor)
        t -= t % granule
        if t >= granule and t not in out:
            out.append(t)
    return out


def _select_tiles(M, N, K, sub, xi, wi, bi, oi, budget, n_tc):
    tm_c = _dim_tile_candidates(M, sub, (512, 256, 128, 64, 32, 16, 8))
    tn_c = _dim_tile_candidates(N, 128, (512, 256, 128))
    tk_c = _dim_tile_candidates(
        K, 128, (16384, 8192, 4096, 2048, 1024, 512, 256, 128))

    def fits(tm, tn, tk, gk):
        f = (2 * tm * tk * xi        # x blocks (double-buffered)
             + 2 * tn * tk * wi      # w blocks
             + 2 * 8 * tn * bi       # bias blocks (sublane-padded)
             + 2 * tm * tn * oi)     # output blocks
        if gk > 1:
            f += tm * tn * 4         # f32 accumulator scratch
        return f <= budget

    def score(tm, tn, tk, gm, gn, gk):
        kw = gk * tk                 # weight K after zero-padding
        hbm = M * K * xi * gn + N * kw * wi * gm + M * N * oi
        s = hbm + 300_000 * (gm * gn * gk)       # ~0.35us/grid-step
        if gm * gn < n_tc:
            s *= 2.0                 # would leave a TensorCore idle (v7x)
        return s

    best, best_s = None, None
    for tm in tm_c:                  # large tm first -> weight reuse priority
        for tn in tn_c:
            for tk in tk_c:
                gm, gn, gk = _cdiv(M, tm), _cdiv(N, tn), _cdiv(K, tk)
                if not fits(tm, tn, tk, gk):
                    continue
                s = score(tm, tn, tk, gm, gn, gk)
                if best_s is None or s < best_s:
                    best, best_s = (tm, tn, tk), s
    assert best is not None, "no tile configuration fits the VMEM budget"
    return best


# ---------------------------------------------------------------------------
# Wrapper
# ---------------------------------------------------------------------------

@functools.partial(jax.jit, static_argnames=("dropout",))
def linear_forward(x, w, b, dropout=0.0):
    """y = dropout(x) @ w.T + b over the last axis of x.

    x: (..., in_features)
    w: (out_features, in_features)   -- PyTorch nn.Linear weight layout
    b: (out_features,)
    """
    assert dropout == 0.0, "eval-mode forward only (dropout is identity)"

    orig_shape = x.shape
    K = orig_shape[-1]
    N = w.shape[0]
    M = 1
    for d in orig_shape[:-1]:
        M *= d
    x2 = x.reshape(M, K)             # metadata-only reshape

    out_dtype = x.dtype
    xi = jnp.dtype(x.dtype).itemsize
    wi = jnp.dtype(w.dtype).itemsize
    bi = jnp.dtype(b.dtype).itemsize
    oi = jnp.dtype(out_dtype).itemsize
    sub = max(8, 32 // xi)           # dtype-aware sublane granule (8/16/32)

    cap = _vmem_capacity_bytes()
    budget = max(int(cap * 0.7), 24 << 20)
    budget = min(budget, cap - (8 << 20))
    budget = max(budget, 16 << 20)
    n_tc = _num_tensorcores()

    tm, tn, tk = _select_tiles(M, N, K, sub, xi, wi, bi, oi, budget, n_tc)
    gm, gn, gk = _cdiv(M, tm), _cdiv(N, tn), _cdiv(K, tk)

    # Only the WEIGHT is zero-padded along K (exact zeros for the contraction
    # tail); the activation stays unpadded and its ragged tail is masked
    # in-kernel, so there is no HBM round trip of the full activation.
    Kw = gk * tk
    wp = w if Kw == K else jnp.pad(w, ((0, 0), (0, Kw - K)))
    b2 = b.reshape(1, N)

    block_bytes = (2 * tm * tk * xi + 2 * tn * tk * wi + 2 * 8 * tn * bi
                   + 2 * tm * tn * oi + (tm * tn * 4 if gk > 1 else 0))
    vmem_limit = int(min(max(2 * block_bytes, 16 << 20), int(cap * 0.85)))

    cost = pl.CostEstimate(
        flops=2 * M * N * K,
        transcendentals=0,
        bytes_accessed=M * K * xi + N * K * wi + N * bi + M * N * oi)

    if gk == 1:
        # tk == K exactly -> single fused dot per output tile, no accumulator.
        kernel = _linear_kernel_fused
        grid = (gm, gn)
        in_specs = [
            pl.BlockSpec((tm, tk), lambda i, j: (i, 0)),   # x  (M, K)
            pl.BlockSpec((tn, tk), lambda i, j: (j, 0)),   # w  (N, K)
            pl.BlockSpec((1, tn), lambda i, j: (0, j)),    # bias
        ]
        out_spec = pl.BlockSpec((tm, tn), lambda i, j: (i, j))
        scratch = []
        dims = ("parallel", "parallel")
    else:
        kernel = functools.partial(_linear_kernel_split, k_valid=K, tk=tk,
                                   mask_k=(K % tk != 0))
        grid = (gm, gn, gk)
        in_specs = [
            pl.BlockSpec((tm, tk), lambda i, j, k: (i, k)),   # x  (M, K)
            pl.BlockSpec((tn, tk), lambda i, j, k: (j, k)),   # w  (N, Kw)
            pl.BlockSpec((1, tn), lambda i, j, k: (0, j)),    # bias
        ]
        out_spec = pl.BlockSpec((tm, tn), lambda i, j, k: (i, j))
        scratch = [pltpu.VMEM((tm, tn), jnp.float32)]
        dims = ("parallel", "parallel", "arbitrary")

    y = pl.pallas_call(
        kernel,
        out_shape=jax.ShapeDtypeStruct((M, N), out_dtype),
        grid_spec=pltpu.PrefetchScalarGridSpec(
            num_scalar_prefetch=0,
            grid=grid,
            in_specs=in_specs,
            out_specs=out_spec,
            scratch_shapes=scratch,
        ),
        compiler_params=pltpu.CompilerParams(
            dimension_semantics=dims,
            vmem_limit_bytes=vmem_limit),
        cost_estimate=cost,
    )(x2, wp, b2)

    return y.reshape(*orig_shape[:-1], N)


def _reference(x, w, b):
    return x @ w.T + b


if __name__ == "__main__":
    key = jax.random.PRNGKey(0)
    k1, k2, k3, k4, k5, k6, k7, k8, k9 = jax.random.split(key, 9)

    # --- Test 1: lane-aligned shapes, 3-D input (Linear over last axis) ---
    B, T, IN, OUT = 2, 8, 256, 128
    bound = 1.0 / (IN ** 0.5)
    x = jax.random.normal(k1, (B, T, IN), dtype=jnp.float32)
    w = jax.random.uniform(k2, (OUT, IN), jnp.float32, -bound, bound)
    b = jax.random.uniform(k3, (OUT,), jnp.float32, -bound, bound)
    y = linear_forward(x, w, b, dropout=0.0)
    jax.block_until_ready(y)
    y_ref = _reference(x, w, b)
    assert y.shape == y_ref.shape
    assert jnp.allclose(y, y_ref, atol=2e-5, rtol=2e-5), "test1 mismatch"

    # --- Test 2: small non-aligned shapes (full-dim blocks, fused path) ---
    M2, IN2, OUT2 = 5, 72, 40
    bound2 = 1.0 / (IN2 ** 0.5)
    x2 = jax.random.normal(k4, (M2, IN2), dtype=jnp.float32)
    w2 = jax.random.uniform(k5, (OUT2, IN2), jnp.float32, -bound2, bound2)
    b2 = jax.random.uniform(k6, (OUT2,), jnp.float32, -bound2, bound2)
    y2 = linear_forward(x2, w2, b2, dropout=0.0)
    jax.block_until_ready(y2)
    y2_ref = _reference(x2, w2, b2)
    assert y2.shape == y2_ref.shape
    assert jnp.allclose(y2, y2_ref, atol=2e-5, rtol=2e-5), "test2 mismatch"

    # --- Test 3: ragged K > 128 exercises split-K + in-kernel K mask ---
    M3, IN3, OUT3 = 12, 200, 40
    bound3 = 1.0 / (IN3 ** 0.5)
    x3 = jax.random.normal(k7, (M3, IN3), dtype=jnp.float32)
    w3 = jax.random.uniform(k8, (OUT3, IN3), jnp.float32, -bound3, bound3)
    b3 = jax.random.uniform(k9, (OUT3,), jnp.float32, -bound3, bound3)
    y3 = linear_forward(x3, w3, b3, dropout=0.0)
    jax.block_until_ready(y3)
    y3_ref = _reference(x3, w3, b3)
    assert y3.shape == y3_ref.shape
    assert jnp.allclose(y3, y3_ref, atol=2e-5, rtol=2e-5), "test3 mismatch"

    print("KERNEL_OK")
</pallas_src>

<mosaic_0001>
module attributes {stable_mosaic.version = 11 : i64} {
  func.func @_linear_kernel_fused(%arg0: i32, %arg1: i32, %arg2: memref<16x256xf32, #tpu.memory_space<vmem>>, %arg3: memref<128x256xf32, #tpu.memory_space<vmem>>, %arg4: memref<1x128xf32, #tpu.memory_space<vmem>>, %arg5: memref<16x128xf32, #tpu.memory_space<vmem>>) attributes {dimension_semantics = [#tpu.dimension_semantics<parallel>, #tpu.dimension_semantics<parallel>], iteration_bounds = array<i64: 1, 1>, scalar_prefetch = 0 : i64, scratch_operands = 0 : i64, tpu.core_type = #tpu.core_type<tc>, window_params = [{transform_indices = @transform_0, window_bounds = array<i64: 16, 256>}, {transform_indices = @transform_1, window_bounds = array<i64: 128, 256>}, {transform_indices = @transform_2, window_bounds = array<i64: 1, 128>}, {transform_indices = @transform_3, window_bounds = array<i64: 16, 128>}]} {
    %c0 = arith.constant 0 : index
    %c0_0 = arith.constant 0 : index
    %0 = vector.load %arg2[%c0, %c0_0] : memref<16x256xf32, #tpu.memory_space<vmem>>, vector<16x256xf32>
    %c0_1 = arith.constant 0 : index
    %c0_2 = arith.constant 0 : index
    %1 = vector.load %arg3[%c0_1, %c0_2] : memref<128x256xf32, #tpu.memory_space<vmem>>, vector<128x256xf32>
    %cst = arith.constant dense<0.000000e+00> : vector<16x128xf32>
    %2 = tpu.matmul %0, %1, %cst {dimension_numbers = #tpu.dot_dimension_numbers<[1], [1], [0], [0], [0, 0, 1, 0], [], []>} : vector<16x256xf32>, vector<128x256xf32>, vector<16x128xf32> -> vector<16x128xf32>
    %c0_3 = arith.constant 0 : index
    %c0_4 = arith.constant 0 : index
    %3 = vector.load %arg4[%c0_3, %c0_4] : memref<1x128xf32, #tpu.memory_space<vmem>>, vector<1x128xf32>
    %4 = vector.broadcast %3 : vector<1x128xf32> to vector<16x128xf32>
    %5 = arith.addf %2, %4 : vector<16x128xf32>
    %c0_5 = arith.constant 0 : index
    %c0_6 = arith.constant 0 : index
    %6 = vector.load %arg5[%c0_5, %c0_6] : memref<16x128xf32, #tpu.memory_space<vmem>>, vector<16x128xf32>
    tpu.vector_store %arg5[%c0_5, %c0_6], %5 {strides = array<i32>} : memref<16x128xf32, #tpu.memory_space<vmem>>, vector<16x128xf32>,
    return
  }
  func.func @transform_0(%arg0: i32, %arg1: i32) -> (i32, i32) {
    %c0_i32 = arith.constant 0 : i32
    %c0_i32_0 = arith.constant 0 : i32
    return %arg0, %c0_i32 : i32, i32
  }
  func.func @transform_1(%arg0: i32, %arg1: i32) -> (i32, i32) {
    %c0_i32 = arith.constant 0 : i32
    %c0_i32_0 = arith.constant 0 : i32
    return %arg1, %c0_i32 : i32, i32
  }
  func.func @transform_2(%arg0: i32, %arg1: i32) -> (i32, i32) {
    %c0_i32 = arith.constant 0 : i32
    %c0_i32_0 = arith.constant 0 : i32
    return %c0_i32, %arg1 : i32, i32
  }
  func.func @transform_3(%arg0: i32, %arg1: i32) -> (i32, i32) {
    %c0_i32 = arith.constant 0 : i32
    return %arg0, %arg1 : i32, i32
  }
}

</mosaic_0001>

<bundles_post_ra>
// kernel: linear_forward.1
= control target key start
LH: loop header
LB: loop body
LE: loop exit
PB: predicated region body
PF: predicated region fallthrough
CT: control target
= control target key end

     0   :  { %8 = vsyncpa [#allocation3], 0  ;;  %s312_s0 = inlined_call_operand.hbm [shape: f32[16,256], index: 0, kind: input, shape index: {}]   ;;  %s313_s1 = inlined_call_operand.hbm [shape: f32[128,256], index: 1, kind: input, shape index: {}]   ;;  %s314_s2 = inlined_call_operand.vmem [shape: f32[1,128], index: 2, kind: input, shape index: {}]   ;;  %s315_s3 = inlined_call_operand.hbm [shape: f32[16,128], index: 3, kind: output, shape index: {}]  }
   0x1   :  { %9 = vsyncpa [#allocation6], 0 }
   0x2   :  { %10 = vsyncpa [#allocation4], 0  ;;  %s15_s14 = sshll.u32 %s312_s0, 4  ;;  %s273_s15 = smov [#allocation2]   ;;  %s16_s14 = int_to_ptr.hbm [resolvable:$true] %s15_s14 }
   0x3   :  { %s17_s16 = sshll.u32 %s273_s15, 4  ;;  %s28_s19 = sshll.u32 %s313_s1, 4  ;;  %s18_s16 = int_to_ptr.vmem [resolvable:$true] %s17_s16  ;;  %s29_s19 = int_to_ptr.hbm [resolvable:$true] %s28_s19 }
   0x4   :  { %s274_s20 = smov 256   ;;  %s275_s21 = smov 16  }
   0x5   :  { %23 = dma.hbm_to_vmem [thread:$0]  %s16_s14, 512, %s18_s16, [#allocation3], %s274_s20, %s274_s20, %s275_s21  }
   0x6   :  { %s276_s22 = smov [#allocation5]  }
   0x7   :  { %s30_s23 = sshll.u32 %s276_s22, 4  ;;  %s31_s23 = int_to_ptr.vmem [resolvable:$true] %s30_s23 }
   0x8   :  { %36 = dma.hbm_to_vmem [thread:$0]  %s29_s19, 4096, %s31_s23, [#allocation6], %s274_s20, %s274_s20, %s275_s21  }
   0x9   :  { %267 = dma.done.wait [#allocation3], 512  }
   0xa   :  { %268 = vsyncadd [#allocation3], 4294966784 }
   0xb   :  { %269 = dma.done.wait [#allocation6], 4096  }
   0xc   :  { %270 = vsyncadd [#allocation6], 4294963200  ;;  %v81_v0 = vld [vmem:[#allocation5 + $0xf0] sm:$0xff]  ;;  %v82_v1 = vld [vmem:[#allocation5 + $0xf8] sm:$0xff]  ;;  %s277_s24 = smov [#allocation7]   ;;  %s141_s28 = sshll.u32 %s315_s3, 4  ;;  %s142_s28 = int_to_ptr.hbm [resolvable:$true] %s141_s28 }
   0xd   :  { %155 = vmatpush.xpose.msra.mxu2 %v81_v0  ;;  %171 = vmatpush.xpose.msra.mxu3 %v82_v1  ;;  %v79_v2 = vld [vmem:[#allocation5 + $0xe0] sm:$0xff]  ;;  %v80_v3 = vld [vmem:[#allocation5 + $0xe8] sm:$0xff]  ;;  %v77_v4 = vld [vmem:[#allocation5 + $0xd0] sm:$0xff]  ;;  %s139_s25 = sshll.u32 %s277_s24, 4  ;;  %s278_s29 = smov 128   ;;  %s140_s25 = int_to_ptr.vmem [resolvable:$true] %s139_s25 }
   0xe   :  { %87 = vmatpush.xpose.msra.mxu0 %v81_v0  ;;  %110 = vmatpush.xpose.msra.mxu1 %v82_v1  ;;  %v78_v5 = vld [vmem:[#allocation5 + $0xd8] sm:$0xff]  ;;  %v75_v6 = vld [vmem:[#allocation5 + $0xc0] sm:$0xff]  ;;  %v76_v7 = vld [vmem:[#allocation5 + $0xc8] sm:$0xff] }
   0xf   :  { %v73_v8 = vld [vmem:[#allocation5 + $0xb0] sm:$0xff]  ;;  %v74_v9 = vld [vmem:[#allocation5 + $0xb8] sm:$0xff]  ;;  %v71_v10 = vld [vmem:[#allocation5 + $0xa0] sm:$0xff] }
  0x10   :  { %v72_v11 = vld [vmem:[#allocation5 + $0xa8] sm:$0xff]  ;;  %v69_v12 = vld [vmem:[#allocation5 + $0x90] sm:$0xff]  ;;  %v70_v13 = vld [vmem:[#allocation5 + $0x98] sm:$0xff] }
  0x11   :  { %156 = vmatpush.xpose.msra.mxu2 %v79_v2  ;;  %172 = vmatpush.xpose.msra.mxu3 %v80_v3  ;;  %v67_v14 = vld [vmem:[#allocation5 + $0x80] sm:$0xff]  ;;  %v68_v15 = vld [vmem:[#allocation5 + $0x88] sm:$0xff]  ;;  %v65_v16 = vld [vmem:[#allocation5 + $0x70] sm:$0xff] }
  0x12   :  { %88 = vmatpush.xpose.msra.mxu0 %v79_v2  ;;  %111 = vmatpush.xpose.msra.mxu1 %v80_v3  ;;  %v66_v17 = vld [vmem:[#allocation5 + $0x78] sm:$0xff]  ;;  %v63_v18 = vld [vmem:[#allocation5 + $0x60] sm:$0xff]  ;;  %v64_v19 = vld [vmem:[#allocation5 + $0x68] sm:$0xff] }
  0x13   :  { %v61_v20 = vld [vmem:[#allocation5 + $0x50] sm:$0xff]  ;;  %v62_v21 = vld [vmem:[#allocation5 + $0x58] sm:$0xff]  ;;  %v59_v22 = vld [vmem:[#allocation5 + $0x40] sm:$0xff] }
  0x14   :  { %v60_v23 = vld [vmem:[#allocation5 + $0x48] sm:$0xff]  ;;  %v57_v24 = vld [vmem:[#allocation5 + $0x30] sm:$0xff]  ;;  %v58_v25 = vld [vmem:[#allocation5 + $0x38] sm:$0xff] }
  0x15   :  { %157 = vmatpush.xpose.msra.mxu2 %v77_v4  ;;  %173 = vmatpush.xpose.msra.mxu3 %v78_v5  ;;  %v55_v26 = vld [vmem:[#allocation5 + $0x20] sm:$0xff]  ;;  %v56_v27 = vld [vmem:[#allocation5 + $0x28] sm:$0xff]  ;;  %v53_v28 = vld [vmem:[#allocation5 + $0x10] sm:$0xff] }
  0x16   :  { %89 = vmatpush.xpose.msra.mxu0 %v77_v4  ;;  %112 = vmatpush.xpose.msra.mxu1 %v78_v5  ;;  %v54_v29 = vld [vmem:[#allocation5 + $0x18] sm:$0xff]  ;;  %v51_v30 = vld [vmem:[#allocation5] sm:$0xff]  ;;  %v52_v31 = vld [vmem:[#allocation5 + $0x8] sm:$0xff] }
  0x17   :  { %v49_v32 = vld [vmem:[#allocation2 + $0x10] sm:$0xff]  ;;  %v50_v33 = vld [vmem:[#allocation2 + $0x18] sm:$0xff]  ;;  %v47_v34 = vld [vmem:[#allocation2] sm:$0xff] }
  0x18   :  { %v48_v35 = vld [vmem:[#allocation2 + $0x8] sm:$0xff]  ;;  %v194_v36 = vld [vmem:[%s314_s2] ss:$0 sm:$0xff]  ;;  %s279_s2 = smov 8  }
  0x19   :  { %158 = vmatpush.xpose.msra.mxu2 %v75_v6  ;;  %174 = vmatpush.xpose.msra.mxu3 %v76_v7 }
  0x1a   :  { %90 = vmatpush.xpose.msra.mxu0 %v75_v6  ;;  %113 = vmatpush.xpose.msra.mxu1 %v76_v7 }
  0x1d   :  { %159 = vmatpush.xpose.msra.mxu2 %v73_v8  ;;  %175 = vmatpush.xpose.msra.mxu3 %v74_v9 }
  0x1e   :  { %91 = vmatpush.xpose.msra.mxu0 %v73_v8  ;;  %114 = vmatpush.xpose.msra.mxu1 %v74_v9 }
  0x21   :  { %160 = vmatpush.xpose.msra.mxu2 %v71_v10  ;;  %176 = vmatpush.xpose.msra.mxu3 %v72_v11 }
  0x22   :  { %92 = vmatpush.xpose.msra.mxu0 %v71_v10  ;;  %115 = vmatpush.xpose.msra.mxu1 %v72_v11 }
  0x25   :  { %161 = vmatpush.xpose.msra.mxu2 %v69_v12  ;;  %177 = vmatpush.xpose.msra.mxu3 %v70_v13 }
  0x26   :  { %93 = vmatpush.xpose.msra.mxu0 %v69_v12  ;;  %116 = vmatpush.xpose.msra.mxu1 %v70_v13 }
  0x29   :  { %162 = vmatpush.xpose.msra.mxu2 %v67_v14  ;;  %178 = vmatpush.xpose.msra.mxu3 %v68_v15 }
  0x2a   :  { %94 = vmatpush.xpose.msra.mxu0 %v67_v14  ;;  %117 = vmatpush.xpose.msra.mxu1 %v68_v15 }
  0x2d   :  { %163 = vmatpush.xpose.msra.mxu2 %v65_v16  ;;  %179 = vmatpush.xpose.msra.mxu3 %v66_v17 }
  0x2e   :  { %95 = vmatpush.xpose.msra.mxu0 %v65_v16  ;;  %118 = vmatpush.xpose.msra.mxu1 %v66_v17 }
  0x31   :  { %164 = vmatpush.xpose.msra.mxu2 %v63_v18  ;;  %180 = vmatpush.xpose.msra.mxu3 %v64_v19 }
  0x32   :  { %96 = vmatpush.xpose.msra.mxu0 %v63_v18  ;;  %119 = vmatpush.xpose.msra.mxu1 %v64_v19 }
  0x35   :  { %165 = vmatpush.xpose.msra.mxu2 %v61_v20  ;;  %181 = vmatpush.xpose.msra.mxu3 %v62_v21 }
  0x36   :  { %97 = vmatpush.xpose.msra.mxu0 %v61_v20  ;;  %120 = vmatpush.xpose.msra.mxu1 %v62_v21 }
  0x39   :  { %166 = vmatpush.xpose.msra.mxu2 %v59_v22  ;;  %182 = vmatpush.xpose.msra.mxu3 %v60_v23 }
  0x3a   :  { %98 = vmatpush.xpose.msra.mxu0 %v59_v22  ;;  %121 = vmatpush.xpose.msra.mxu1 %v60_v23 }
  0x3d   :  { %167 = vmatpush.xpose.msra.mxu2 %v57_v24  ;;  %183 = vmatpush.xpose.msra.mxu3 %v58_v25 }
  0x3e   :  { %99 = vmatpush.xpose.msra.mxu0 %v57_v24  ;;  %122 = vmatpush.xpose.msra.mxu1 %v58_v25 }
  0x41   :  { %168 = vmatpush.xpose.msra.mxu2 %v55_v26  ;;  %184 = vmatpush.xpose.msra.mxu3 %v56_v27 }
  0x42   :  { %100 = vmatpush.xpose.msra.mxu0 %v55_v26  ;;  %123 = vmatpush.xpose.msra.mxu1 %v56_v27 }
  0x45   :  { %169 = vmatpush.xpose.msra.mxu2 %v53_v28  ;;  %185 = vmatpush.xpose.msra.mxu3 %v54_v29 }
  0x46   :  { %101 = vmatpush.xpose.msra.mxu0 %v53_v28  ;;  %124 = vmatpush.xpose.msra.mxu1 %v54_v29 }
  0x49   :  { %170 = vmatpush.xpose.msra.mxu2 %v51_v30  ;;  %186 = vmatpush.xpose.msra.mxu3 %v52_v31 }
  0x4a   :  { %102 = vmatpush.xpose.msra.mxu0 %v51_v30  ;;  %125 = vmatpush.xpose.msra.mxu1 %v52_v31 }
  0x4c   :  { %106 = vmatmul.f32.vlgmr.msra.gmra.mxu2 %v49_v32  ;;  %129 = vmatmul.f32.vlgmr.msra.gmra.mxu3 %v50_v33 }
  0x4d   :  { %103 = vmatmul.f32.vlgmr.msra.gmra.mxu0 %v47_v34  ;;  %126 = vmatmul.f32.vlgmr.msra.gmra.mxu1 %v48_v35 }
  0xca   :  { %v104_v37 = vpop.f32.mrf.mxu0  ;;  %v127_v38 = vpop.f32.mrf.mxu1 }
  0xcb   :  { %v105_v39 = vadd.f32 %v194_v36, %v104_v37 }
  0xcd   :  { %v128_v40 = vadd.f32 %v127_v38, %v105_v39 }
  0xcf   :  { %v107_v41 = vpop.f32.mrf.mxu2  ;;  %133 = vst [vmem:[#allocation7] sm:$0xff] %v128_v40  ;;  %v130_v42 = vpop.f32.mrf.mxu3 }
  0xd0   :  { %v108_v43 = vadd.f32 %v194_v36, %v107_v41 }
  0xd2   :  { %v131_v44 = vadd.f32 %v130_v42, %v108_v43 }
  0xd4   :  { %134 = vst [vmem:[#allocation7 + $0x8] sm:$0xff] %v131_v44 }
  0xd5   :  { %147 = dma.vmem_to_hbm [thread:$0]  %s140_s25, 256, %s142_s28, [#allocation4], %s278_s29, %s278_s29, %s279_s2  }
  0xd6   :  { %271 = dma.done.wait [#allocation4], 256  }
  0xd7   :  { %272 = vsyncadd [#allocation4], 4294967040 }
  0xd8   :  { %152 = vsyncpa [#allocation3], 1 }
  0xd9   :  { %153 = vsyncpa [#allocation6], 1 }
  0xda   :  { %154 = vsyncpa [#allocation4], 1 }

</bundles_post_ra>
